<compile_context>
chip_gen: v5e
topology: v5e:2x2
jax: 0.10.0
libtpu: 0.0.40
codegen_flags: <defaults>
</compile_context>

<pallas_src>
import functools

import numpy as np
import jax
import jax.numpy as jnp
from jax import lax
from jax.experimental import pallas as pl
from jax.experimental.pallas import tpu as pltpu


# bf16 feeds the MXU natively on v5e/v6e/v7x and halves HBM<->VMEM bytes for the
# memory-bound activations; accumulation is always f32.
DEFAULT_COMPUTE_DTYPE = jnp.bfloat16


# ---------------------------------------------------------------------------
# Fused residual-branch kernel: works on a (C, block_batch*H*W) slab,
# the flattened (batch, spatial) axis sits on the 128-lane axis.
# ---------------------------------------------------------------------------
def _branch_kernel(x2_ref, masks_ref,
                   w1cat_ref, b1cat_ref, wdw_ref, b2_ref, w3_ref, b3_ref,
                   wse1_ref, bse1_ref, wse2_ref, bse2_ref,
                   y_ref, *, W, HW, block_batch, approx_recip):
    Ch = w1cat_ref.shape[0] // 2
    L = block_batch * HW

    x = x2_ref[...]                         # (C2, L)   compute dtype (bf16/f32)
    w1cat = w1cat_ref[...]                  # (2Ch, C2) compute dtype, BN folded
    b1cat = b1cat_ref[...]                  # (2Ch, 1)  f32

    # ---- conv1(1x1)+BN+ReLU and shortcut(1x1)+BN fused into ONE batched MXU matmul
    ts = jnp.dot(w1cat, x, preferred_element_type=jnp.float32) + b1cat
    t = jnp.maximum(ts[:Ch], 0.0)           # (Ch, L) f32
    sc = ts[Ch:]                            # (Ch, L) f32
    # TODO(synk): for production Ch (>=128) spill `sc` to a VMEM scratch here and
    # reload before the residual add to bound vreg live ranges.

    # ---- 3x3 depthwise conv: 9 lane rolls + precomputed 0/1 halo masks.
    # Cross-image leakage from rolling over the block boundary is killed by the
    # same masks that zero the out-of-image halo.
    wdw = wdw_ref[...]                      # (Ch, 9) f32, BN scale folded
    masks = masks_ref[...]                  # (9, L)  f32 (centre row unused)
    acc = t * wdw[:, 4:5] + b2_ref[...]     # centre tap seeds the accumulator
    for dh in (-1, 0, 1):
        for dw in (-1, 0, 1):
            if dh == 0 and dw == 0:
                continue
            k = (dh + 1) * 3 + (dw + 1)
            offs = dh * W + dw
            rolled = pltpu.roll(t, (-offs) % L, axis=1)
            acc = acc + (rolled * wdw[:, k:k + 1]) * masks[k:k + 1, :]

    # ---- conv3 (1x1) + BN, again one batched MXU matmul.
    w3 = w3_ref[...]                        # (Ch, Ch) compute dtype, BN folded
    u = jnp.dot(w3, acc.astype(w3.dtype),
                preferred_element_type=jnp.float32) + b3_ref[...]   # (Ch, L) f32

    # ---- SE (reduction=2) + gate + residual add + ReLU, per image of the block.
    # SE itself is tiny; gating/stores stay lane-dense (HW is a multiple of 128).
    wse1 = wse1_ref[...]                    # (Ch, Chse)  fc1 weight, transposed
    bse1 = bse1_ref[...]                    # (1, Chse)
    wse2 = wse2_ref[...]                    # (Ch, Chse)
    bse2 = bse2_ref[...]                    # (Ch, 1)
    for b in range(block_batch):
        lo = b * HW
        u_b = u[:, lo:lo + HW]
        sc_b = sc[:, lo:lo + HW]
        pooled = jnp.mean(u_b, axis=1, keepdims=True)                     # (Ch, 1)
        z = jnp.sum(wse1 * pooled, axis=0, keepdims=True) + bse1          # (1, Chse)
        z = jnp.maximum(z, 0.0)
        gl = jnp.sum(wse2 * z, axis=1, keepdims=True) + bse2              # (Ch, 1)
        g = pl.reciprocal(1.0 + jnp.exp(-gl), approx=approx_recip)        # sigmoid (EUP)
        out_b = jnp.maximum(u_b * g + sc_b, 0.0)
        y_ref[:, lo:lo + HW] = out_b.astype(y_ref.dtype)


# ---------------------------------------------------------------------------
# Wrapper
# ---------------------------------------------------------------------------
def _full_spec(arr):
    nd = arr.ndim
    return pl.BlockSpec(arr.shape, lambda n, _nd=nd: (0,) * _nd)


def _pick_block_batch(N, C2, Ch, HW, itemsize, target_bytes=1 << 20):
    """~1 MiB of in+out per grid step, grid length >= 2 (v7x megacore), divides N."""
    per_img = max((C2 + Ch) * HW * itemsize, 1)
    bb = max(1, target_bytes // per_img)
    if N >= 2:
        bb = min(bb, N // 2)
    bb = max(1, min(bb, N))
    while N % bb:
        bb -= 1
    return bb


def resblock_branch(x2_flat, packed, H, W, block_batch=None,
                    compute_dtype=DEFAULT_COMPUTE_DTYPE):
    """Fused branch on x2 of shape (N, C2, H*W); returns (N, Ch, H*W)."""
    N, C2, HW = x2_flat.shape
    Ch = packed["w1cat"].shape[0] // 2
    assert HW == H * W
    assert HW % 128 == 0, "roll-based depthwise path needs H*W to be a multiple of 128"
    # TODO(synk): for spatial sizes with H*W % 128 != 0 (e.g. 56x56), strip-mine H
    # with a 1-row halo instead of flattening the whole image onto the lane axis.
    # NOTE: Ch / C2 not multiples of 8 (f32) / 16 (bf16) only waste sublane padding.

    cdt = jnp.dtype(compute_dtype)
    if block_batch is None:
        block_batch = _pick_block_batch(N, C2, Ch, HW, cdt.itemsize)
    assert N % block_batch == 0
    B, L = block_batch, block_batch * HW

    # Batch block on the lane axis, carried through HBM in the compute dtype.
    x2_t = jnp.transpose(x2_flat, (1, 0, 2)).reshape(C2, N * HW).astype(compute_dtype)

    # Precomputed per-tap halo masks (output-position validity of each 3x3 neighbour),
    # tiled across the images of a block.  Built once on host; no in-kernel //W, %W.
    pos = np.arange(HW)
    r, c = pos // W, pos % W
    masks_np = np.ones((9, HW), np.float32)
    for dh in (-1, 0, 1):
        for dw in (-1, 0, 1):
            k = (dh + 1) * 3 + (dw + 1)
            valid = ((r + dh >= 0) & (r + dh < H) & (c + dw >= 0) & (c + dw < W))
            masks_np[k] = valid.astype(np.float32)
    masks = jnp.asarray(np.tile(masks_np, (1, B)))                     # (9, L)

    consts = (masks,
              packed["w1cat"].astype(compute_dtype), packed["b1cat"],
              packed["wdw"], packed["b2"],
              packed["w3"].astype(compute_dtype), packed["b3"],
              packed["wse1"], packed["bse1"], packed["wse2"], packed["bse2"])

    flops = (2 * (2 * Ch * C2 + Ch * Ch) + 9 * 3 * Ch) * N * HW
    bytes_accessed = (C2 + Ch) * N * HW * cdt.itemsize \
        + sum(int(np.prod(a.shape)) * 4 for a in consts)
    cost = pl.CostEstimate(flops=int(flops), transcendentals=int(N * Ch),
                           bytes_accessed=int(bytes_accessed))

    approx_recip = cdt != jnp.dtype(jnp.float32)

    y2_t = pl.pallas_call(
        functools.partial(_branch_kernel, W=W, HW=HW, block_batch=B,
                          approx_recip=approx_recip),
        out_shape=jax.ShapeDtypeStruct((Ch, N * HW), compute_dtype),
        grid_spec=pltpu.PrefetchScalarGridSpec(
            num_scalar_prefetch=0,
            grid=(N // B,),
            in_specs=[pl.BlockSpec((C2, L), lambda n: (0, n))]
                     + [_full_spec(a) for a in consts],
            out_specs=pl.BlockSpec((Ch, L), lambda n: (0, n)),
        ),
        compiler_params=pltpu.CompilerParams(
            dimension_semantics=("parallel",),
            # v5e's scoped default is only 16 MiB; 48 MiB fits under v7x's 64 MiB.
            vmem_limit_bytes=48 * 1024 * 1024),
        cost_estimate=cost,
    )(x2_t, *consts)

    return jnp.transpose(y2_t.reshape(Ch, N, HW), (1, 0, 2)).astype(x2_flat.dtype)


def channel_shuffle(x, g):
    n, c, h, w = x.shape
    return x.reshape(n, g, c // g, h, w).transpose(0, 2, 1, 3, 4).reshape(n, c, h, w)


def _shuffle_perm(c_out, g):
    j = np.arange(c_out)
    return (j % g) * (c_out // g) + (j // g)


def resblock_forward(x, packed, shuffle_groups=2, block_batch=None,
                     compute_dtype=DEFAULT_COMPUTE_DTYPE):
    """Full SEResBlock forward: split, fused branch kernel, concat+shuffle as one
    static channel permutation."""
    N, C, H, W = x.shape
    c = C // 2
    Ch = packed["w1cat"].shape[0] // 2
    C_out = c + Ch
    x1 = x[:, :c]
    x2 = x[:, c:].reshape(N, C - c, H * W)
    y2 = resblock_branch(x2, packed, H, W, block_batch=block_batch,
                         compute_dtype=compute_dtype).reshape(N, Ch, H, W)
    # concat + channel_shuffle(g) as a single static channel gather.
    # TODO(synk): fold this permutation into the consumer layer's channel indexing
    # to drop this HBM pass entirely.
    perm = _shuffle_perm(C_out, shuffle_groups)
    y = jnp.concatenate([x1, y2.astype(x.dtype)], axis=1)
    return y[:, perm]


# ---------------------------------------------------------------------------
# Parameters (eval-mode BN folded) and pure-JAX reference
# ---------------------------------------------------------------------------
def make_params(key, in_channels, out_channels, dtype=jnp.float32):
    c_half = in_channels // 2
    c2 = in_channels - c_half
    ch = out_channels - c_half
    chse = ch // 2
    ks = jax.random.split(key, 12)

    def bn(k, n):
        kg, kb, km, kv = jax.random.split(k, 4)
        gamma = 1.0 + 0.1 * jax.random.normal(kg, (n,))
        beta = 0.1 * jax.random.normal(kb, (n,))
        mean = 0.1 * jax.random.normal(km, (n,))
        var = jax.random.uniform(kv, (n,), minval=0.5, maxval=1.5)
        scale = gamma / jnp.sqrt(var + 1e-5)
        bias = beta - mean * scale
        return scale.astype(dtype), bias.astype(dtype)

    w1 = (0.3 * jax.random.normal(ks[0], (ch, c2))).astype(dtype)
    s1, b1 = bn(ks[1], ch)
    wdw = (0.3 * jax.random.normal(ks[2], (ch, 3, 3))).astype(dtype)
    s2, b2 = bn(ks[3], ch)
    w3 = (0.3 * jax.random.normal(ks[4], (ch, ch))).astype(dtype)
    s3, b3 = bn(ks[5], ch)
    if in_channels != out_channels:
        wsc = (0.3 * jax.random.normal(ks[6], (ch, c2))).astype(dtype)
        ssc, bsc = bn(ks[7], ch)
    else:
        wsc = jnp.eye(ch, c2, dtype=dtype)
        ssc = jnp.ones((ch,), dtype)
        bsc = jnp.zeros((ch,), dtype)
    wse1 = (0.3 * jax.random.normal(ks[8], (chse, ch))).astype(dtype)
    bse1 = (0.1 * jax.random.normal(ks[9], (chse,))).astype(dtype)
    wse2 = (0.3 * jax.random.normal(ks[10], (ch, chse))).astype(dtype)
    bse2 = (0.1 * jax.random.normal(ks[11], (ch,))).astype(dtype)
    return dict(w1=w1, s1=s1, b1=b1, wdw=wdw, s2=s2, b2=b2, w3=w3, s3=s3, b3=b3,
                wsc=wsc, ssc=ssc, bsc=bsc, wse1=wse1, bse1=bse1, wse2=wse2, bse2=bse2)


def pack_params(p):
    """Fold BN scales into conv weights; conv1+shortcut concatenated into one matmul
    weight; depthwise taps flattened to (Ch, 9); per-channel biases as (Ch, 1)."""
    ch = p["w1"].shape[0]
    w1cat = jnp.concatenate([p["w1"] * p["s1"][:, None],
                             p["wsc"] * p["ssc"][:, None]], axis=0)        # (2Ch, C2)
    b1cat = jnp.concatenate([p["b1"], p["bsc"]], axis=0)[:, None]          # (2Ch, 1)
    wdw = (p["wdw"] * p["s2"][:, None, None]).reshape(ch, 9)               # (Ch, 9)
    return dict(w1cat=w1cat, b1cat=b1cat,
                wdw=wdw, b2=p["b2"][:, None],
                w3=p["w3"] * p["s3"][:, None], b3=p["b3"][:, None],
                wse1=p["wse1"].T, bse1=p["bse1"][None, :],
                wse2=p["wse2"], bse2=p["bse2"][:, None])


def reference_forward(x, params, shuffle_groups=2):
    """Pure-JAX reference mirroring the PyTorch forward (NCHW), incl. the SE module."""
    N, C, H, W = x.shape
    c = C // 2
    x1, x2 = x[:, :c], x[:, c:]

    def conv1x1(t, w):
        return jnp.einsum('nchw,oc->nohw', t, w)

    def bn(t, s, b):
        return t * s.reshape(1, -1, 1, 1) + b.reshape(1, -1, 1, 1)

    t = jax.nn.relu(bn(conv1x1(x2, params['w1']), params['s1'], params['b1']))
    t = lax.conv_general_dilated(t, params['wdw'][:, None, :, :], (1, 1), ((1, 1), (1, 1)),
                                 dimension_numbers=('NCHW', 'OIHW', 'NCHW'),
                                 feature_group_count=t.shape[1])
    t = bn(t, params['s2'], params['b2'])
    t = bn(conv1x1(t, params['w3']), params['s3'], params['b3'])
    pooled = jnp.mean(t, axis=(2, 3))
    z = jax.nn.relu(pooled @ params['wse1'].T + params['bse1'])
    g = jax.nn.sigmoid(z @ params['wse2'].T + params['bse2'])
    t = t * g[:, :, None, None]
    sc = bn(conv1x1(x2, params['wsc']), params['ssc'], params['bsc'])
    y2 = jax.nn.relu(t + sc)
    y = jnp.concatenate([x1, y2], axis=1)
    return channel_shuffle(y, shuffle_groups)


if __name__ == "__main__":
    key = jax.random.PRNGKey(0)
    kx, kp = jax.random.split(key)

    N, C_in, C_out, H, W = 2, 8, 16, 16, 16       # in != out -> projection shortcut path
    x = jax.random.normal(kx, (N, C_in, H, W), jnp.float32)
    params = make_params(kp, C_in, C_out)
    packed = pack_params(params)

    ref = jax.block_until_ready(reference_forward(x, params))

    # f32 path: validates exact semantics at tight tolerance.
    out_f32 = jax.block_until_ready(
        resblock_forward(x, packed, compute_dtype=jnp.float32))
    assert out_f32.shape == (N, C_out, H, W), out_f32.shape
    np.testing.assert_allclose(np.asarray(out_f32), np.asarray(ref), atol=2e-3, rtol=2e-3)

    # Default bf16 path: MXU-native weights + bf16 HBM carry, f32 accumulation.
    out_bf16 = jax.block_until_ready(resblock_forward(x, packed))
    assert out_bf16.shape == (N, C_out, H, W), out_bf16.shape
    np.testing.assert_allclose(np.asarray(out_bf16), np.asarray(ref), atol=5e-2, rtol=5e-2)

    print("KERNEL_OK")
</pallas_src>

<mosaic_0001>
module attributes {stable_mosaic.version = 11 : i64} {
  func.func @_branch_kernel(%arg0: i32, %arg1: memref<4x256xf32, #tpu.memory_space<vmem>>, %arg2: memref<9x256xf32, #tpu.memory_space<vmem>>, %arg3: memref<24x4xf32, #tpu.memory_space<vmem>>, %arg4: memref<24x1xf32, #tpu.memory_space<vmem>>, %arg5: memref<12x9xf32, #tpu.memory_space<vmem>>, %arg6: memref<12x1xf32, #tpu.memory_space<vmem>>, %arg7: memref<12x12xf32, #tpu.memory_space<vmem>>, %arg8: memref<12x1xf32, #tpu.memory_space<vmem>>, %arg9: memref<12x6xf32, #tpu.memory_space<vmem>>, %arg10: memref<1x6xf32, #tpu.memory_space<vmem>>, %arg11: memref<12x6xf32, #tpu.memory_space<vmem>>, %arg12: memref<12x1xf32, #tpu.memory_space<vmem>>, %arg13: memref<12x256xf32, #tpu.memory_space<vmem>>) attributes {dimension_semantics = [#tpu.dimension_semantics<parallel>], iteration_bounds = array<i64: 2>, scalar_prefetch = 0 : i64, scratch_operands = 0 : i64, tpu.core_type = #tpu.core_type<tc>, window_params = [{transform_indices = @transform_0, window_bounds = array<i64: 4, 256>}, {pipeline_mode = #tpu.pipeline_mode<synchronous>, transform_indices = @transform_1, window_bounds = array<i64: 9, 256>}, {pipeline_mode = #tpu.pipeline_mode<synchronous>, transform_indices = @transform_2, window_bounds = array<i64: 24, 4>}, {pipeline_mode = #tpu.pipeline_mode<synchronous>, transform_indices = @transform_3, window_bounds = array<i64: 24, 1>}, {pipeline_mode = #tpu.pipeline_mode<synchronous>, transform_indices = @transform_4, window_bounds = array<i64: 12, 9>}, {pipeline_mode = #tpu.pipeline_mode<synchronous>, transform_indices = @transform_5, window_bounds = array<i64: 12, 1>}, {pipeline_mode = #tpu.pipeline_mode<synchronous>, transform_indices = @transform_6, window_bounds = array<i64: 12, 12>}, {pipeline_mode = #tpu.pipeline_mode<synchronous>, transform_indices = @transform_7, window_bounds = array<i64: 12, 1>}, {pipeline_mode = #tpu.pipeline_mode<synchronous>, transform_indices = @transform_8, window_bounds = array<i64: 12, 6>}, {pipeline_mode = #tpu.pipeline_mode<synchronous>, transform_indices = @transform_9, window_bounds = array<i64: 1, 6>}, {pipeline_mode = #tpu.pipeline_mode<synchronous>, transform_indices = @transform_10, window_bounds = array<i64: 12, 6>}, {pipeline_mode = #tpu.pipeline_mode<synchronous>, transform_indices = @transform_11, window_bounds = array<i64: 12, 1>}, {transform_indices = @transform_12, window_bounds = array<i64: 12, 256>}]} {
    %c0 = arith.constant 0 : index
    %c0_0 = arith.constant 0 : index
    %0 = vector.load %arg1[%c0, %c0_0] : memref<4x256xf32, #tpu.memory_space<vmem>>, vector<4x256xf32>
    %c0_1 = arith.constant 0 : index
    %c0_2 = arith.constant 0 : index
    %1 = vector.load %arg3[%c0_1, %c0_2] : memref<24x4xf32, #tpu.memory_space<vmem>>, vector<24x4xf32>
    %c0_3 = arith.constant 0 : index
    %c0_4 = arith.constant 0 : index
    %2 = vector.load %arg4[%c0_3, %c0_4] : memref<24x1xf32, #tpu.memory_space<vmem>>, vector<24x1xf32>
    %cst = arith.constant dense<0.000000e+00> : vector<24x256xf32>
    %3 = tpu.matmul %1, %0, %cst {dimension_numbers = #tpu.dot_dimension_numbers<[1], [0], [0], [1], [0, 0, 1, 1], [], []>} : vector<24x4xf32>, vector<4x256xf32>, vector<24x256xf32> -> vector<24x256xf32>
    %4 = vector.broadcast %2 : vector<24x1xf32> to vector<24x256xf32>
    %5 = arith.addf %3, %4 : vector<24x256xf32>
    %6 = vector.extract_strided_slice %5 {offsets = [0, 0], sizes = [12, 256], strides = [1, 1]} : vector<24x256xf32> to vector<12x256xf32>
    %cst_5 = arith.constant 0.000000e+00 : f32
    %7 = vector.broadcast %cst_5 : f32 to vector<12x256xf32>
    %8 = arith.maximumf %6, %7 : vector<12x256xf32>
    %9 = vector.extract_strided_slice %5 {offsets = [12, 0], sizes = [12, 256], strides = [1, 1]} : vector<24x256xf32> to vector<12x256xf32>
    %c0_6 = arith.constant 0 : index
    %c0_7 = arith.constant 0 : index
    %10 = vector.load %arg5[%c0_6, %c0_7] : memref<12x9xf32, #tpu.memory_space<vmem>>, vector<12x9xf32>
    %c0_8 = arith.constant 0 : index
    %c0_9 = arith.constant 0 : index
    %11 = vector.load %arg2[%c0_8, %c0_9] : memref<9x256xf32, #tpu.memory_space<vmem>>, vector<9x256xf32>
    %12 = vector.extract_strided_slice %10 {offsets = [0, 4], sizes = [12, 1], strides = [1, 1]} : vector<12x9xf32> to vector<12x1xf32>
    %13 = vector.broadcast %12 : vector<12x1xf32> to vector<12x256xf32>
    %14 = arith.mulf %8, %13 : vector<12x256xf32>
    %c0_10 = arith.constant 0 : index
    %c0_11 = arith.constant 0 : index
    %15 = vector.load %arg6[%c0_10, %c0_11] : memref<12x1xf32, #tpu.memory_space<vmem>>, vector<12x1xf32>
    %16 = vector.broadcast %15 : vector<12x1xf32> to vector<12x256xf32>
    %17 = arith.addf %14, %16 : vector<12x256xf32>
    %c17_i32 = arith.constant 17 : i32
    %18 = tpu.dynamic_rotate %8 by %c17_i32 dim 1 : vector<12x256xf32>, i32 -> vector<12x256xf32>
    %19 = vector.extract_strided_slice %10 {offsets = [0, 0], sizes = [12, 1], strides = [1, 1]} : vector<12x9xf32> to vector<12x1xf32>
    %20 = vector.broadcast %19 : vector<12x1xf32> to vector<12x256xf32>
    %21 = arith.mulf %18, %20 : vector<12x256xf32>
    %22 = vector.extract_strided_slice %11 {offsets = [0, 0], sizes = [1, 256], strides = [1, 1]} : vector<9x256xf32> to vector<1x256xf32>
    %23 = vector.broadcast %22 : vector<1x256xf32> to vector<12x256xf32>
    %24 = arith.mulf %21, %23 : vector<12x256xf32>
    %25 = arith.addf %17, %24 : vector<12x256xf32>
    %c16_i32 = arith.constant 16 : i32
    %26 = tpu.dynamic_rotate %8 by %c16_i32 dim 1 : vector<12x256xf32>, i32 -> vector<12x256xf32>
    %27 = vector.extract_strided_slice %10 {offsets = [0, 1], sizes = [12, 1], strides = [1, 1]} : vector<12x9xf32> to vector<12x1xf32>
    %28 = vector.broadcast %27 : vector<12x1xf32> to vector<12x256xf32>
    %29 = arith.mulf %26, %28 : vector<12x256xf32>
    %30 = vector.extract_strided_slice %11 {offsets = [1, 0], sizes = [1, 256], strides = [1, 1]} : vector<9x256xf32> to vector<1x256xf32>
    %31 = vector.broadcast %30 : vector<1x256xf32> to vector<12x256xf32>
    %32 = arith.mulf %29, %31 : vector<12x256xf32>
    %33 = arith.addf %25, %32 : vector<12x256xf32>
    %c15_i32 = arith.constant 15 : i32
    %34 = tpu.dynamic_rotate %8 by %c15_i32 dim 1 : vector<12x256xf32>, i32 -> vector<12x256xf32>
    %35 = vector.extract_strided_slice %10 {offsets = [0, 2], sizes = [12, 1], strides = [1, 1]} : vector<12x9xf32> to vector<12x1xf32>
    %36 = vector.broadcast %35 : vector<12x1xf32> to vector<12x256xf32>
    %37 = arith.mulf %34, %36 : vector<12x256xf32>
    %38 = vector.extract_strided_slice %11 {offsets = [2, 0], sizes = [1, 256], strides = [1, 1]} : vector<9x256xf32> to vector<1x256xf32>
    %39 = vector.broadcast %38 : vector<1x256xf32> to vector<12x256xf32>
    %40 = arith.mulf %37, %39 : vector<12x256xf32>
    %41 = arith.addf %33, %40 : vector<12x256xf32>
    %c1_i32 = arith.constant 1 : i32
    %42 = tpu.dynamic_rotate %8 by %c1_i32 dim 1 : vector<12x256xf32>, i32 -> vector<12x256xf32>
    %43 = vector.extract_strided_slice %10 {offsets = [0, 3], sizes = [12, 1], strides = [1, 1]} : vector<12x9xf32> to vector<12x1xf32>
    %44 = vector.broadcast %43 : vector<12x1xf32> to vector<12x256xf32>
    %45 = arith.mulf %42, %44 : vector<12x256xf32>
    %46 = vector.extract_strided_slice %11 {offsets = [3, 0], sizes = [1, 256], strides = [1, 1]} : vector<9x256xf32> to vector<1x256xf32>
    %47 = vector.broadcast %46 : vector<1x256xf32> to vector<12x256xf32>
    %48 = arith.mulf %45, %47 : vector<12x256xf32>
    %49 = arith.addf %41, %48 : vector<12x256xf32>
    %c255_i32 = arith.constant 255 : i32
    %50 = tpu.dynamic_rotate %8 by %c255_i32 dim 1 : vector<12x256xf32>, i32 -> vector<12x256xf32>
    %51 = vector.extract_strided_slice %10 {offsets = [0, 5], sizes = [12, 1], strides = [1, 1]} : vector<12x9xf32> to vector<12x1xf32>
    %52 = vector.broadcast %51 : vector<12x1xf32> to vector<12x256xf32>
    %53 = arith.mulf %50, %52 : vector<12x256xf32>
    %54 = vector.extract_strided_slice %11 {offsets = [5, 0], sizes = [1, 256], strides = [1, 1]} : vector<9x256xf32> to vector<1x256xf32>
    %55 = vector.broadcast %54 : vector<1x256xf32> to vector<12x256xf32>
    %56 = arith.mulf %53, %55 : vector<12x256xf32>
    %57 = arith.addf %49, %56 : vector<12x256xf32>
    %c241_i32 = arith.constant 241 : i32
    %58 = tpu.dynamic_rotate %8 by %c241_i32 dim 1 : vector<12x256xf32>, i32 -> vector<12x256xf32>
    %59 = vector.extract_strided_slice %10 {offsets = [0, 6], sizes = [12, 1], strides = [1, 1]} : vector<12x9xf32> to vector<12x1xf32>
    %60 = vector.broadcast %59 : vector<12x1xf32> to vector<12x256xf32>
    %61 = arith.mulf %58, %60 : vector<12x256xf32>
    %62 = vector.extract_strided_slice %11 {offsets = [6, 0], sizes = [1, 256], strides = [1, 1]} : vector<9x256xf32> to vector<1x256xf32>
    %63 = vector.broadcast %62 : vector<1x256xf32> to vector<12x256xf32>
    %64 = arith.mulf %61, %63 : vector<12x256xf32>
    %65 = arith.addf %57, %64 : vector<12x256xf32>
    %c240_i32 = arith.constant 240 : i32
    %66 = tpu.dynamic_rotate %8 by %c240_i32 dim 1 : vector<12x256xf32>, i32 -> vector<12x256xf32>
    %67 = vector.extract_strided_slice %10 {offsets = [0, 7], sizes = [12, 1], strides = [1, 1]} : vector<12x9xf32> to vector<12x1xf32>
    %68 = vector.broadcast %67 : vector<12x1xf32> to vector<12x256xf32>
    %69 = arith.mulf %66, %68 : vector<12x256xf32>
    %70 = vector.extract_strided_slice %11 {offsets = [7, 0], sizes = [1, 256], strides = [1, 1]} : vector<9x256xf32> to vector<1x256xf32>
    %71 = vector.broadcast %70 : vector<1x256xf32> to vector<12x256xf32>
    %72 = arith.mulf %69, %71 : vector<12x256xf32>
    %73 = arith.addf %65, %72 : vector<12x256xf32>
    %c239_i32 = arith.constant 239 : i32
    %74 = tpu.dynamic_rotate %8 by %c239_i32 dim 1 : vector<12x256xf32>, i32 -> vector<12x256xf32>
    %75 = vector.extract_strided_slice %10 {offsets = [0, 8], sizes = [12, 1], strides = [1, 1]} : vector<12x9xf32> to vector<12x1xf32>
    %76 = vector.broadcast %75 : vector<12x1xf32> to vector<12x256xf32>
    %77 = arith.mulf %74, %76 : vector<12x256xf32>
    %78 = vector.extract_strided_slice %11 {offsets = [8, 0], sizes = [1, 256], strides = [1, 1]} : vector<9x256xf32> to vector<1x256xf32>
    %79 = vector.broadcast %78 : vector<1x256xf32> to vector<12x256xf32>
    %80 = arith.mulf %77, %79 : vector<12x256xf32>
    %81 = arith.addf %73, %80 : vector<12x256xf32>
    %c0_12 = arith.constant 0 : index
    %c0_13 = arith.constant 0 : index
    %82 = vector.load %arg7[%c0_12, %c0_13] : memref<12x12xf32, #tpu.memory_space<vmem>>, vector<12x12xf32>
    %cst_14 = arith.constant dense<0.000000e+00> : vector<12x256xf32>
    %83 = tpu.matmul %82, %81, %cst_14 {dimension_numbers = #tpu.dot_dimension_numbers<[1], [0], [0], [1], [0, 0, 1, 1], [], []>} : vector<12x12xf32>, vector<12x256xf32>, vector<12x256xf32> -> vector<12x256xf32>
    %c0_15 = arith.constant 0 : index
    %c0_16 = arith.constant 0 : index
    %84 = vector.load %arg8[%c0_15, %c0_16] : memref<12x1xf32, #tpu.memory_space<vmem>>, vector<12x1xf32>
    %85 = vector.broadcast %84 : vector<12x1xf32> to vector<12x256xf32>
    %86 = arith.addf %83, %85 : vector<12x256xf32>
    %c0_17 = arith.constant 0 : index
    %c0_18 = arith.constant 0 : index
    %87 = vector.load %arg9[%c0_17, %c0_18] : memref<12x6xf32, #tpu.memory_space<vmem>>, vector<12x6xf32>
    %c0_19 = arith.constant 0 : index
    %c0_20 = arith.constant 0 : index
    %88 = vector.load %arg10[%c0_19, %c0_20] : memref<1x6xf32, #tpu.memory_space<vmem>>, vector<1x6xf32>
    %c0_21 = arith.constant 0 : index
    %c0_22 = arith.constant 0 : index
    %89 = vector.load %arg11[%c0_21, %c0_22] : memref<12x6xf32, #tpu.memory_space<vmem>>, vector<12x6xf32>
    %c0_23 = arith.constant 0 : index
    %c0_24 = arith.constant 0 : index
    %90 = vector.load %arg12[%c0_23, %c0_24] : memref<12x1xf32, #tpu.memory_space<vmem>>, vector<12x1xf32>
    %cst_25 = arith.constant dense<0.000000e+00> : vector<12xf32>
    %91 = vector.multi_reduction <add>, %86, %cst_25 [1] : vector<12x256xf32> to vector<12xf32>
    %92 = vector.shape_cast %91 : vector<12xf32> to vector<12x1xf32>
    %cst_26 = arith.constant 2.560000e+02 : f32
    %93 = vector.broadcast %cst_26 : f32 to vector<12x1xf32>
    %94 = arith.divf %92, %93 : vector<12x1xf32>
    %95 = vector.broadcast %94 : vector<12x1xf32> to vector<12x6xf32>
    %96 = arith.mulf %87, %95 : vector<12x6xf32>
    %cst_27 = arith.constant dense<0.000000e+00> : vector<6xf32>
    %97 = vector.multi_reduction <add>, %96, %cst_27 [0] : vector<12x6xf32> to vector<6xf32>
    %98 = vector.shape_cast %97 : vector<6xf32> to vector<1x6xf32>
    %99 = arith.addf %98, %88 : vector<1x6xf32>
    %cst_28 = arith.constant 0.000000e+00 : f32
    %100 = vector.broadcast %cst_28 : f32 to vector<1x6xf32>
    %101 = arith.maximumf %99, %100 : vector<1x6xf32>
    %102 = vector.broadcast %101 : vector<1x6xf32> to vector<12x6xf32>
    %103 = arith.mulf %89, %102 : vector<12x6xf32>
    %cst_29 = arith.constant dense<0.000000e+00> : vector<12xf32>
    %104 = vector.multi_reduction <add>, %103, %cst_29 [1] : vector<12x6xf32> to vector<12xf32>
    %105 = vector.shape_cast %104 : vector<12xf32> to vector<12x1xf32>
    %106 = arith.addf %105, %90 : vector<12x1xf32>
    %cst_30 = arith.constant 0.000000e+00 : f32
    %107 = vector.broadcast %cst_30 : f32 to vector<12x1xf32>
    %108 = arith.subf %107, %106 : vector<12x1xf32>
    %109 = math.exp %108 : vector<12x1xf32>
    %cst_31 = arith.constant 1.000000e+00 : f32
    %110 = vector.broadcast %cst_31 : f32 to vector<12x1xf32>
    %111 = arith.addf %110, %109 : vector<12x1xf32>
    %112 = tpu.reciprocal %111 : vector<12x1xf32> -> vector<12x1xf32>
    %113 = vector.broadcast %112 : vector<12x1xf32> to vector<12x256xf32>
    %114 = arith.mulf %86, %113 : vector<12x256xf32>
    %115 = arith.addf %114, %9 : vector<12x256xf32>
    %cst_32 = arith.constant 0.000000e+00 : f32
    %116 = vector.broadcast %cst_32 : f32 to vector<12x256xf32>
    %117 = arith.maximumf %115, %116 : vector<12x256xf32>
    %c0_33 = arith.constant 0 : index
    %c0_34 = arith.constant 0 : index
    %118 = vector.load %arg13[%c0_33, %c0_34] : memref<12x256xf32, #tpu.memory_space<vmem>>, vector<12x256xf32>
    tpu.vector_store %arg13[%c0_33, %c0_34], %117 {strides = array<i32>} : memref<12x256xf32, #tpu.memory_space<vmem>>, vector<12x256xf32>,
    return
  }
  func.func @transform_0(%arg0: i32) -> (i32, i32) {
    %c0_i32 = arith.constant 0 : i32
    %c0_i32_0 = arith.constant 0 : i32
    return %c0_i32, %arg0 : i32, i32
  }
  func.func @transform_1(%arg0: i32) -> (i32, i32) {
    %c0_i32 = arith.constant 0 : i32
    %c0_i32_0 = arith.constant 0 : i32
    %c0_i32_1 = arith.constant 0 : i32
    return %c0_i32, %c0_i32_0 : i32, i32
  }
  func.func @transform_2(%arg0: i32) -> (i32, i32) {
    %c0_i32 = arith.constant 0 : i32
    %c0_i32_0 = arith.constant 0 : i32
    %c0_i32_1 = arith.constant 0 : i32
    return %c0_i32, %c0_i32_0 : i32, i32
  }
  func.func @transform_3(%arg0: i32) -> (i32, i32) {
    %c0_i32 = arith.constant 0 : i32
    %c0_i32_0 = arith.constant 0 : i32
    %c0_i32_1 = arith.constant 0 : i32
    return %c0_i32, %c0_i32_0 : i32, i32
  }
  func.func @transform_4(%arg0: i32) -> (i32, i32) {
    %c0_i32 = arith.constant 0 : i32
    %c0_i32_0 = arith.constant 0 : i32
    %c0_i32_1 = arith.constant 0 : i32
    return %c0_i32, %c0_i32_0 : i32, i32
  }
  func.func @transform_5(%arg0: i32) -> (i32, i32) {
    %c0_i32 = arith.constant 0 : i32
    %c0_i32_0 = arith.constant 0 : i32
    %c0_i32_1 = arith.constant 0 : i32
    return %c0_i32, %c0_i32_0 : i32, i32
  }
  func.func @transform_6(%arg0: i32) -> (i32, i32) {
    %c0_i32 = arith.constant 0 : i32
    %c0_i32_0 = arith.constant 0 : i32
    %c0_i32_1 = arith.constant 0 : i32
    return %c0_i32, %c0_i32_0 : i32, i32
  }
  func.func @transform_7(%arg0: i32) -> (i32, i32) {
    %c0_i32 = arith.constant 0 : i32
    %c0_i32_0 = arith.constant 0 : i32
    %c0_i32_1 = arith.constant 0 : i32
    return %c0_i32, %c0_i32_0 : i32, i32
  }
  func.func @transform_8(%arg0: i32) -> (i32, i32) {
    %c0_i32 = arith.constant 0 : i32
    %c0_i32_0 = arith.constant 0 : i32
    %c0_i32_1 = arith.constant 0 : i32
    return %c0_i32, %c0_i32_0 : i32, i32
  }
  func.func @transform_9(%arg0: i32) -> (i32, i32) {
    %c0_i32 = arith.constant 0 : i32
    %c0_i32_0 = arith.constant 0 : i32
    %c0_i32_1 = arith.constant 0 : i32
    return %c0_i32, %c0_i32_0 : i32, i32
  }
  func.func @transform_10(%arg0: i32) -> (i32, i32) {
    %c0_i32 = arith.constant 0 : i32
    %c0_i32_0 = arith.constant 0 : i32
    %c0_i32_1 = arith.constant 0 : i32
    return %c0_i32, %c0_i32_0 : i32, i32
  }
  func.func @transform_11(%arg0: i32) -> (i32, i32) {
    %c0_i32 = arith.constant 0 : i32
    %c0_i32_0 = arith.constant 0 : i32
    %c0_i32_1 = arith.constant 0 : i32
    return %c0_i32, %c0_i32_0 : i32, i32
  }
  func.func @transform_12(%arg0: i32) -> (i32, i32) {
    %c0_i32 = arith.constant 0 : i32
    %c0_i32_0 = arith.constant 0 : i32
    return %c0_i32, %arg0 : i32, i32
  }
}

</mosaic_0001>

<bundles_post_ra>
// kernel: tpu_custom_call.1
= control target key start
LH: loop header
LB: loop body
LE: loop exit
PB: predicated region body
PF: predicated region fallthrough
CT: control target
= control target key end

     0   :  { %s1842_s0 = inlined_call_operand.vmem [shape: f32[4,512], index: 0, kind: input, shape index: {}]   ;;  %s1843_s1 = inlined_call_operand.vmem [shape: f32[9,256], index: 1, kind: input, shape index: {}]   ;;  %s1844_s2 = inlined_call_operand.vmem [shape: f32[24,4], index: 2, kind: input, shape index: {}]   ;;  %s1845_s3 = inlined_call_operand.vmem [shape: f32[24,1], index: 3, kind: input, shape index: {}]   ;;  %s1846_s4 = inlined_call_operand.vmem [shape: f32[12,9], index: 4, kind: input, shape index: {}]   ;;  %s1847_s5 = inlined_call_operand.vmem [shape: f32[12,1], index: 5, kind: input, shape index: {}]   ;;  %s1848_s6 = inlined_call_operand.vmem [shape: f32[12,12], index: 6, kind: input, shape index: {}]   ;;  %s1849_s7 = inlined_call_operand.vmem [shape: f32[12,1], index: 7, kind: input, shape index: {}]   ;;  %s1850_s8 = inlined_call_operand.vmem [shape: f32[12,6], index: 8, kind: input, shape index: {}]   ;;  %s1851_s9 = inlined_call_operand.vmem [shape: f32[1,6], index: 9, kind: input, shape index: {}]   ;;  %s1852_s10 = inlined_call_operand.vmem [shape: f32[12,6], index: 10, kind: input, shape index: {}]   ;;  %s1853_s11 = inlined_call_operand.vmem [shape: f32[12,1], index: 11, kind: input, shape index: {}]   ;;  %s1854_s12 = inlined_call_operand.hbm [shape: f32[12,512], index: 12, kind: output, shape index: {}]  }
   0x1   :  { %1856 = sst [smem:[#allocation5_spill]] %s1842_s0 }
   0x2   :  { %1857 = sst [smem:[#allocation6_spill]] %s1843_s1 }
   0x3   :  { %1858 = sst [smem:[#allocation7_spill]] %s1844_s2 }
   0x4   :  { %17 = vsyncpa [#allocation3], 0 }
   0x5   :  { %19 = vsyncpa [#allocation3 + $0x1], 0  ;;  %s1372_s21 = smov 0   ;;  %s1374_s22 = smov 0  }
   0x6   :  { %s1376_s23 = smov 0   ;;  %s1378_s24 = smov 0  }
   0x7 LB: > { %s1393_s25 = sadd.s32 4294967295, %s1285_s24   ;;  %s1107_s26 = sadd.s32 4294967294, %s1285_s24   ;;  %s1285_s24 = sphi %s1378_s24, %s1868_s24   ;;  %s1281_s23 = sphi %s1376_s23, %s1867_s23   ;;  %s1277_s22 = sphi %s1374_s22, %s1866_s22   ;;  %s1273_s21 = sphi %s1372_s21, %s1865_s21  }
   0x8   : > { %s1397_s27 = sadd.s32 1, %s1285_s24   ;;  %s289_s28 = sadd.s32 1, %s1281_s23 }
   0x9   : > { %s286_s29 = ssub.s32 %s1285_s24, %s1397_s27  ;;  %p299_p0 = scmp.ne.s32.totalorder %s1281_s23, %s1277_s22 }
   0xa   : > { %p287_p1 = scmp.eq.s32.totalorder %s286_s29, 0  ;;  %p300_p2 = scmp.eq.s32.totalorder %s1393_s25, 1 }
   0xb   : > { %p305_p3 = scmp.ne.s32.totalorder %s1277_s22, %s1273_s21  ;;  %p306_p4 = scmp.eq.s32.totalorder %s1107_s26, 1 }
   0xc   : > { %s1408_s30 = scalar_select %p287_p1, %s1281_s23, %s289_s28  }
   0xd   : > { %p1410_p5 = por %p300_p2, %p299_p0  ;;  %p1414_p6 = por %p306_p4, %p305_p3 }
   0xe   : > { %p1110_p7 = scmp.ge.s32.totalorder %s1285_s24, 1  ;;  %p366_p8 = scmp.lt.s32.totalorder %s1285_s24, 3 }
  0x10   : > { %p367_p9 = pnand %p1110_p7, %p366_p8 }
  0x11   : > { %s1112_s17 = sshll.u32 (!%p367_p9), %s1393_s25, 1  ;;  %s1861_s0 = sld [smem:[#allocation5_spill]] (!%p367_p9) }
  0x12   : > { %370 = sbr.rel (%p367_p9) target bundleno = 961 (0x3c1), region = 68  ;;  %p409_p10 = scmp.lt.s32.totalorder (!%p367_p9), %s1112_s17, 3 }
  0x13   : > { %s1862_s2 = sld [smem:[#allocation7_spill]] (!%p367_p9)  ;;  %s1296_s19 = smov (!%p367_p9), 17  }
  0x14   : > { %s1298_s20 = smov (!%p367_p9), 15   ;;  %s1299_s26 = smov (!%p367_p9), 1  }
  0x15   : > { %s1301_s29 = smov (!%p367_p9), 113   ;;  %s1302_s15 = smov (!%p367_p9), 112  }
  0x16   : > { %s1863_s1 = sld [smem:[#allocation6_spill]] (!%p367_p9) }
  0x17   : > { %v420_v0 = vld [vmem:[%s1845_s3 + $0x8] sm:$0xff]  ;;  %v1287_v1 = vmov 0   ;;  %v1428_v2 = vld [vmem:[%s1846_s4] sm:$0xff]  ;;  %v1288_v3 = vmov 4   ;;  %s1870_s17 = smov (!%p409_p10, %s1112_s17), 3  ;;  %v1289_v7 = vmov 1   ;;  %v556_v53 = vlaneseq }
  0x18   : > { %1193 = vset.pattern.permute.xlu0 %v1287_v1  ;;  %1196 = vset.pattern.permute.xlu1 %v1288_v3  ;;  %v1433_v4 = vld [vmem:[%s1846_s4 + $0x8] sm:$0xf]  ;;  %s1113_s28 = sshll.u32 %s1870_s17, 2  ;;  %v419_v5 = vld [vmem:[%s1845_s3] sm:$0xff]  ;;  %vm451_vm0 = vcmask 1043456   ;;  %vm441_vm1 = vcmask 31744  }
  0x19   : > { %429 = vperm.xlu0 %1193, %v420_v0   ;;  %520 = vperm.xlu1 %1196, %v1428_v2   ;;  %s412_s16 = scalar_lea.vmem %s1861_s0, %s1113_s28  ;;  %v416_v8 = vld [vmem:[%s1862_s2] sm:$0xff]  ;;  %v533_v11 = vld [vmem:[%s1847_s5 + $0x8] sm:$0xf]  ;;  %v1290_v14 = vmov 2   ;;  %v1291_v15 = vmov 3   ;;  %v1292_v16 = vmov 5  }
  0x1a   : > { %1194 = vset.pattern.permute.xlu2 %v1288_v3  ;;  %v415_v6 = vld [vmem:[%s412_s16] sm:$0xff]  ;;  %v417_v12 = vld [vmem:[%s1862_s2 + $0x8] sm:$0xff]  ;;  %v1293_v17 = vmov 6   ;;  %v1294_v18 = vmov 7   ;;  %v1295_v19 = vmov 8   ;;  %s1855_s17 = smov 16  }
  0x1b   : > { %525 = vperm.xlu2 %1194, %v1433_v4   ;;  %438 = vst [vmem:[#allocation1] ss:$2 sm:$0xff] %v415_v6  ;;  %v532_v13 = vld [vmem:[%s1847_s5] sm:$0xff]  ;;  %s1300_s28 = smov 127   ;;  %s1303_s16 = smov 111   ;;  %v1540_v55 = vand.u32 127, %v556_v53 }
  0x1c   : > { %v833_v56 = vld [vmem:[%s1849_s7 + $0x8] sm:$0xf]  ;;  %v1548_v57 = vld [vmem:[%s1863_s1] sm:$0xff]  ;;  %vm844_vm10 = vcmask 97280   ;;  %vm929_vm12 = vcmask 48128   ;;  %vm931_vm13 = vcmask 44032  }
  0x1d   : > { %v1553_v58 = vld [vmem:[%s1863_s1 + $0x8] sm:$0xff]  ;;  %vm558_vm2 = vcmp.lt.s32.totalorder %v1540_v55, 17  ;;  %v575_v63 = vperm.slane %v1548_v57, 0  ;;  %vm593_vm3 = vcmp.lt.s32.totalorder %v1540_v55, 16  ;;  %vm628_vm4 = vcmp.lt.s32.totalorder %v1540_v55, 15 }
  0x1e   : > { %v576_v0 = vperm.slane %v1553_v58, 0  ;;  %vm663_vm5 = vcmp.lt.s32.totalorder %v1540_v55, 1  ;;  %v681_v53 = vperm.slane %v1553_v58, 3  ;;  %vm698_vm6 = vcmp.lt.s32.totalorder %v1540_v55, 127 }
  0x1f   : > { %vm733_vm7 = vcmp.lt.s32.totalorder %v1540_v55, 113  ;;  %vm768_vm8 = vcmp.lt.s32.totalorder %v1540_v55, 112  ;;  %vm803_vm9 = vcmp.lt.s32.totalorder %v1540_v55, 111  ;;  %v831_v55 = vld [vmem:[%s1848_s6 + $0x8] sm:$0xf] }
  0x21   : > { %424 = vperm.xlu0 %1193, %v419_v5   ;;  %1197 = vset.pattern.permute.xlu1 %v1289_v7 }
  0x22   : > { %603 = vperm.xlu1 %1197, %v1433_v4   ;;  %v439_v9 = vld.sshfl [vmem:[#allocation1] sm:$0xff pattern:$0x75316420]  ;;  %v440_v10 = vld.sshfl [vmem:[#allocation1 + $0x8] sm:$0xff pattern:$0x75316420] }
  0x23   : > { %1195 = vset.pattern.permute.xlu2 %v1287_v1  ;;  %1114 = vmatpush.msk.msra.mxu0 %vm451_vm0, %v439_v9 }
  0x24   : > { %568 = vperm.xlu2 %1195, %v1433_v4   ;;  %1118 = vmatpush.msk.msra.mxu1 %vm451_vm0, %v440_v10 }
  0x25   : > { %1115 = vmatmul.msk.f32.vlgmr.msra.gmra.mxu0 %vm441_vm1, %v416_v8  ;;  %1119 = vmatmul.msk.f32.vlgmr.msra.gmra.mxu1 %vm441_vm1, %v416_v8 }
  0x29   : > { %564 = vperm.xlu0 %1193, %v1428_v2  }
  0x2a   : > { %599 = vperm.xlu1 %1197, %v1428_v2  }
  0x2c   : > { %541 = vperm.xlu2 %1195, %v533_v11  }
  0x2d   : > { %1116 = vmatmul.msk.f32.gmra.mxu0 %vm441_vm1, %v417_v12  ;;  %1120 = vmatmul.msk.f32.gmra.mxu1 %vm441_vm1, %v417_v12 }
  0x31   : > { %536 = vperm.xlu0 %1193, %v532_v13  }
  0x32   : > { %1199 = vset.pattern.permute.xlu1 %v1290_v14 }
  0x33   : > { %634 = vperm.xlu1 %1199, %v1428_v2  }
  0x34   : > { %1198 = vset.pattern.permute.xlu2 %v1290_v14  ;;  %v610_v14 = vperm.slane %v1548_v57, 1 }
  0x35   : > { %638 = vperm.xlu2 %1198, %v1433_v4  }
  0x3b   : > { %1201 = vset.pattern.permute.xlu1 %v1291_v15 }
  0x3c   : > { %669 = vperm.xlu1 %1201, %v1428_v2  }
  0x3d   : > { %1200 = vset.pattern.permute.xlu2 %v1291_v15  ;;  %v611_v15 = vperm.slane %v1553_v58, 1 }
  0x3e   : > { %673 = vperm.xlu2 %1200, %v1433_v4  }
  0x44   : > { %1203 = vset.pattern.permute.xlu1 %v1292_v16 }
  0x45   : > { %704 = vperm.xlu1 %1203, %v1428_v2  }
  0x46   : > { %1202 = vset.pattern.permute.xlu2 %v1292_v16 }
  0x47   : > { %708 = vperm.xlu2 %1202, %v1433_v4  }
  0x4d   : > { %1205 = vset.pattern.permute.xlu1 %v1293_v17 }
  0x4e   : > { %739 = vperm.xlu1 %1205, %v1428_v2  }
  0x4f   : > { %1204 = vset.pattern.permute.xlu2 %v1293_v17 }
  0x50   : > { %743 = vperm.xlu2 %1204, %v1433_v4  }
  0x56   : > { %1207 = vset.pattern.permute.xlu1 %v1294_v18 }
  0x58   : > { %1206 = vset.pattern.permute.xlu2 %v1294_v18 }
  0x59   : > { %778 = vperm.xlu2 %1206, %v1433_v4  }
  0x61   : > { %1208 = vset.pattern.permute.xlu2 %v1295_v19 }
  0x75   : > { %v526_v21 = vpop.permute.xlu2 %525 }
  0x7e   : > { %v1475_v27 = vpop.permute.xlu2 %568 }
  0x86   : > { %v542_v36 = vpop.permute.xlu2 %541 }
  0x8b   : > { %v430_v20 = vpop.permute.xlu0 %429  ;;  %v521_v41 = vpop.permute.xlu1 %520 }
  0x8f   : > { %v1522_v44 = vpop.permute.xlu2 %638 }
  0x93   : > { %v425_v22 = vpop.permute.xlu0 %424 }
  0x94   : > { %v1515_v42 = vpop.permute.xlu1 %603 }
  0x98   : > { %v1527_v46 = vpop.permute.xlu2 %673 }
  0x9b   : > { %v565_v50 = vpop.permute.xlu0 %564 }
  0x9c   : > { %v600_v43 = vpop.permute.xlu1 %599 }
  0xa1   : > { %v1531_v48 = vpop.permute.xlu2 %708 }
  0xa2   : > { %v473_v23 = vpop.f32.mrf.mxu0  ;;  %v499_v24 = vpop.f32.mrf.mxu1 }
  0xa3   : > { %v474_v25 = vadd.f32 %v473_v23, %v425_v22  ;;  %v500_v26 = vadd.f32 %v499_v24, %v425_v22  ;;  %v537_v54 = vpop.permute.xlu0 %536 }
  0xa5   : > { %v1477_v28 = vmax.f32 %v474_v25, 0.0  ;;  %v1479_v29 = vmax.f32 %v500_v26, 0.0  ;;  %v635_v45 = vpop.permute.xlu1 %634  ;;  %v645_v26 = vperm.slane %v1548_v57, 2 }
  0xa7   : > { %552 = vrot.lane.b32.xlu1 %v1479_v29, %s1296_s19  ;;  %585 = vrot.lane.b32.xlu2 %v1477_v28, %s1855_s17  ;;  %v528_v61 = vmul.f32 %v521_v41, %v1477_v28  ;;  %v529_v62 = vmul.f32 %v521_v41, %v1479_v29 }
  0xa8   : > { %548 = vrot.lane.b32.xlu0 %v1477_v28, %s1296_s19 }
  0xa9   : > { %v544_v6 = vadd.f32 %v537_v54, %v528_v61  ;;  %v545_v7 = vadd.f32 %v537_v54, %v529_v62 }
  0xaa   : > { %v476_v30 = vpop.f32.mrf.mxu0  ;;  %v502_v31 = vpop.f32.mrf.mxu1 }
  0xab   : > { %v1487_v32 = vadd.f32 %v476_v30, %v430_v20  ;;  %v1489_v33 = vadd.f32 %v502_v31, %v430_v20  ;;  %v1535_v51 = vpop.permute.xlu2 %743 }
  0xad   : > { %v510_v34 = vmax.f32 %v1487_v32, 0.0  ;;  %v511_v35 = vmax.f32 %v1489_v33, 0.0 }
  0xae   : > { %v1529_v47 = vpop.permute.xlu1 %669 }
  0xaf   : > { %624 = vrot.lane.b32.xlu1 %v1479_v29, %s1298_s20  ;;  %587 = vrot.lane.b32.xlu2 %v510_v34, %s1855_s17  ;;  %v530_v37 = vmul.f32 %v526_v21, %v510_v34  ;;  %v531_v38 = vmul.f32 %v526_v21, %v511_v35 }
  0xb0   : > { %589 = vrot.lane.b32.xlu0 %v1479_v29, %s1855_s17 }
  0xb1   : > { %v1498_v39 = vadd.f32 %v542_v36, %v530_v37  ;;  %v1500_v40 = vadd.f32 %v542_v36, %v531_v38 }
  0xb3   : > { %v1555_v59 = vpop.permute.xlu2 %778 }
  0xb7   : > { %659 = vrot.lane.b32.xlu1 %v1479_v29, %s1299_s26  ;;  %813 = vperm.xlu2 %1208, %v1433_v4   ;;  %v1533_v49 = vpop.permute.xlu1 %704 }
  0xb8   : > { %620 = vrot.lane.b32.xlu0 %v1477_v28, %s1298_s20 }
  0xbf   : > { %694 = vrot.lane.b32.xlu1 %v1479_v29, %s1300_s28  ;;  %626 = vrot.lane.b32.xlu2 %v511_v35, %s1298_s20 }
  0xc0   : > { %655 = vrot.lane.b32.xlu0 %v1477_v28, %s1299_s26  ;;  %v1537_v52 = vpop.permute.xlu1 %739 }
  0xc7   : > { %729 = vrot.lane.b32.xlu1 %v1479_v29, %s1301_s29  ;;  %657 = vrot.lane.b32.xlu2 %v510_v34, %s1299_s26 }
  0xc8   : > { %690 = vrot.lane.b32.xlu0 %v1477_v28, %s1300_s28 }
  0xcf   : > { %764 = vrot.lane.b32.xlu1 %v1479_v29, %s1302_s15  ;;  %692 = vrot.lane.b32.xlu2 %v510_v34, %s1300_s28 }
  0xd0   : > { %725 = vrot.lane.b32.xlu0 %v1477_v28, %s1301_s29 }
  0xd7   : > { %550 = vrot.lane.b32.xlu1 %v510_v34, %s1296_s19  ;;  %727 = vrot.lane.b32.xlu2 %v510_v34, %s1301_s29 }
  0xd8   : > { %760 = vrot.lane.b32.xlu0 %v1477_v28, %s1302_s15 }
  0xdf   : > { %554 = vrot.lane.b32.xlu1 %v511_v35, %s1296_s19  ;;  %762 = vrot.lane.b32.xlu2 %v510_v34, %s1302_s15 }
  0xe0   : > { %591 = vrot.lane.b32.xlu0 %v511_v35, %s1855_s17  ;;  %s1243_s17 = scalar_lea.hbm %s1854_s12, 64 }
  0xe7   : > { %622 = vrot.lane.b32.xlu1 %v510_v34, %s1298_s20  ;;  %797 = vrot.lane.b32.xlu2 %v510_v34, %s1303_s16  ;;  %s405_s20 = sand.u32 1, %s1277_s22  }
  0xe8   : > { %661 = vrot.lane.b32.xlu0 %v511_v35, %s1299_s26  ;;  %s1111_s26 = sshll.u32 %s405_s20, 5 }
  0xef   : > { %774 = vperm.xlu1 %1207, %v1428_v2   ;;  %809 = vperm.xlu2 %1208, %v1428_v2  }
  0xf0   : > { %696 = vrot.lane.b32.xlu0 %v511_v35, %s1300_s28  ;;  %s1133_s28 = sshll.u32 %s1393_s25, 4  ;;  %s407_s25 = scalar_lea.vmem [#allocation2], %s1111_s26 }
  0xf1   : > { %s1042_s18 = sshll.u32 %s407_s25, 4  ;;  %s1043_s18 = int_to_ptr.vmem [resolvable:$true] %s1042_s18 }
  0xf7   : > { %799 = vrot.lane.b32.xlu1 %v1479_v29, %s1303_s16  ;;  %1210 = vset.pattern.permute.xlu2 %v1287_v1 }
  0xf8   : > { %731 = vrot.lane.b32.xlu0 %v511_v35, %s1301_s29  ;;  %1209 = vset.pattern.permute.xlu1 %v1287_v1 }
 0x100   : > { %766 = vrot.lane.b32.xlu0 %v511_v35, %s1302_s15 }
 0x101   : > { %v586_v13 = vpop.permute.xlu2 %585 }
 0x108   : > { %801 = vrot.lane.b32.xlu0 %v511_v35, %s1303_s16 }
 0x110   : > { %795 = vrot.lane.b32.xlu0 %v1477_v28, %s1303_s16  ;;  %v646_v28 = vperm.slane %v1553_v58, 2  ;;  %s1041_s16 = scalar_lea.hbm %s1854_s12, %s1133_s28  ;;  %s1030_s28 = scalar_lea.sflag [#allocation3], %s405_s20 }
 0x111   : > { %s1044_s19 = sshll.u32 %s1041_s16, 4  ;;  %s1045_s19 = int_to_ptr.hbm [resolvable:$true] %s1044_s19 }
 0x112   : > { %s1237_s29 = sshra.s32 %s1045_s19, 4  ;;  %s1238_s29 = int_to_ptr.hbm [resolvable:$true] %s1237_s29 }
 0x113   : > { %s1239_s15 = scalar_lea.hbm %s1238_s29, 32  ;;  %p1244_p0 = scmp.lt.s32.totalorder %s1238_s29, %s1854_s12 }
 0x114   : > { %p1240_p11 = scmp.ne.s32.totalorder %s1238_s29, %s1239_s15  ;;  %p1245_p1 = scmp.lt.s32.totalorder %s1243_s17, %s1239_s15 }
 0x116   : > { %p1241_p12 = pnand %p1240_p11, %p1410_p5  ;;  %p1246_p2 = por %p1245_p1, %p1244_p0 }
 0x118   : > { %841 = vperm.xlu0 %1193, %v833_v56   ;;  %v588_v56 = vpop.permute.xlu2 %587  ;;  %p1242_p13 = pneg %p1241_p12 }
 0x119   : > { %v553_v60 = vpop.permute.xlu1 %552 }
 0x11a   : > { %v549_v1 = vpop.permute.xlu0 %548  ;;  %p1247_p3 = pnand %p1246_p2, %p1242_p13 }
 0x11b   : > { %v559_v2 = vsel %vm558_vm2, %v549_v1, %v553_v60  ;;  %v561_v3 = vsel %vm558_vm2, %v553_v60, %v549_v1 }
 0x11c   : > { %v571_v4 = vmul.f32 %v565_v50, %v561_v3  ;;  %v572_v5 = vmul.f32 %v565_v50, %v559_v2  ;;  %v680_v50 = vperm.slane %v1548_v57, 3 }
 0x11e   : > { %v577_v8 = vmul.f32 %v575_v63, %v571_v4  ;;  %v578_v9 = vmul.f32 %v576_v0, %v572_v5 }
 0x120   : > { %v581_v10 = vadd.f32 %v577_v8, %v544_v6  ;;  %v582_v11 = vadd.f32 %v578_v9, %v545_v7  ;;  %v715_v6 = vperm.slane %v1548_v57, 5  ;;  %v716_v7 = vperm.slane %v1553_v58, 5 }
 0x121   : > { %v625_v12 = vpop.permute.xlu1 %624 }
 0x122   : > { %v590_v16 = vpop.permute.xlu0 %589 }
 0x123   : > { %v594_v17 = vsel %vm593_vm3, %v586_v13, %v590_v16  ;;  %v596_v18 = vsel %vm593_vm3, %v590_v16, %v586_v13 }
 0x124   : > { %v606_v19 = vmul.f32 %v600_v43, %v596_v18  ;;  %v607_v20 = vmul.f32 %v600_v43, %v594_v17 }
 0x126   : > { %v612_v21 = vmul.f32 %v610_v14, %v606_v19  ;;  %v613_v22 = vmul.f32 %v611_v15, %v607_v20  ;;  %v750_v20 = vperm.slane %v1548_v57, 6 }
 0x128   : > { %v616_v23 = vadd.f32 %v612_v21, %v581_v10  ;;  %v617_v24 = vadd.f32 %v613_v22, %v582_v11  ;;  %v751_v21 = vperm.slane %v1553_v58, 6 }
 0x129   : > { %v660_v25 = vpop.permute.xlu1 %659 }
 0x12a   : > { %v621_v29 = vpop.permute.xlu0 %620 }
 0x12b   : > { %v629_v30 = vsel %vm628_vm4, %v621_v29, %v625_v12  ;;  %v631_v31 = vsel %vm628_vm4, %v625_v12, %v621_v29  ;;  %v1614_v12 = vpop.permute.xlu2 %813 }
 0x12c   : > { %v641_v34 = vmul.f32 %v635_v45, %v631_v31  ;;  %v642_v35 = vmul.f32 %v635_v45, %v629_v30 }
 0x12e   : > { %v647_v36 = vmul.f32 %v645_v26, %v641_v34  ;;  %v648_v37 = vmul.f32 %v646_v28, %v642_v35 }
 0x130   : > { %v651_v38 = vadd.f32 %v647_v36, %v616_v23  ;;  %v652_v41 = vadd.f32 %v648_v37, %v617_v24 }
 0x131   : > { %v695_v43 = vpop.permute.xlu1 %694 }
 0x132   : > { %v656_v54 = vpop.permute.xlu0 %655 }
 0x133   : > { %v664_v45 = vsel %vm663_vm5, %v656_v54, %v660_v25  ;;  %v666_v60 = vsel %vm663_vm5, %v660_v25, %v656_v54  ;;  %v627_v31 = vpop.permute.xlu2 %626 }
 0x134   : > { %v676_v61 = vmul.f32 %v1529_v47, %v666_v60  ;;  %v677_v62 = vmul.f32 %v1529_v47, %v664_v45 }
 0x136   : > { %v682_v1 = vmul.f32 %v680_v50, %v676_v61  ;;  %v683_v2 = vmul.f32 %v681_v53, %v677_v62 }
 0x138   : > { %v686_v3 = vadd.f32 %v682_v1, %v651_v38  ;;  %v687_v4 = vadd.f32 %v683_v2, %v652_v41 }
 0x139   : > { %v730_v5 = vpop.permute.xlu1 %729 }
 0x13a   : > { %v691_v8 = vpop.permute.xlu0 %690 }
 0x13b   : > { %v699_v9 = vsel %vm698_vm6, %v691_v8, %v695_v43  ;;  %v701_v47 = vsel %vm698_vm6, %v695_v43, %v691_v8  ;;  %v658_v38 = vpop.permute.xlu2 %657 }
 0x13c   : > { %v711_v10 = vmul.f32 %v1533_v49, %v699_v9  ;;  %v712_v11 = vmul.f32 %v1533_v49, %v701_v47 }
 0x13e   : > { %v717_v13 = vmul.f32 %v715_v6, %v711_v10  ;;  %v718_v16 = vmul.f32 %v716_v7, %v712_v11 }
 0x140   : > { %v721_v17 = vadd.f32 %v717_v13, %v686_v3  ;;  %v722_v18 = vadd.f32 %v718_v16, %v687_v4 }
 0x141   : > { %v1621_v19 = vpop.permute.xlu1 %764 }
 0x142   : > { %v726_v22 = vpop.permute.xlu0 %725 }
 0x143   : > { %v734_v49 = vsel %vm733_vm7, %v726_v22, %v730_v5  ;;  %v736_v23 = vsel %vm733_vm7, %v730_v5, %v726_v22  ;;  %v693_v45 = vpop.permute.xlu2 %692 }
 0x144   : > { %v746_v24 = vmul.f32 %v1537_v52, %v734_v49  ;;  %v747_v25 = vmul.f32 %v1537_v52, %v736_v23 }
 0x146   : > { %v752_v29 = vmul.f32 %v750_v20, %v746_v24  ;;  %v753_v30 = vmul.f32 %v751_v21, %v747_v25 }
 0x148   : > { %v1635_v34 = vadd.f32 %v753_v30, %v722_v18  ;;  %v1637_v35 = vadd.f32 %v752_v29, %v721_v17 }
 0x149   : > { %v551_v37 = vpop.permute.xlu1 %550 }
 0x14a   : > { %v1639_v36 = vpop.permute.xlu0 %760 }
 0x14b   : > { %v728_v11 = vpop.permute.xlu2 %727 }
 0x151   : > { %v555_v43 = vpop.permute.xlu1 %554 }
 0x152   : > { %v592_v41 = vpop.permute.xlu0 %591  ;;  %v560_v52 = vsel %vm558_vm2, %v551_v37, %v555_v43  ;;  %v562_v60 = vsel %vm558_vm2, %v555_v43, %v551_v37 }
 0x153   : > { %v573_v61 = vmul.f32 %v1475_v27, %v562_v60  ;;  %v574_v62 = vmul.f32 %v1475_v27, %v560_v52  ;;  %v595_v2 = vsel %vm593_vm3, %v588_v56, %v592_v41  ;;  %v597_v3 = vsel %vm593_vm3, %v592_v41, %v588_v56  ;;  %v763_v41 = vpop.permute.xlu2 %762 }
 0x154   : > { %v608_v47 = vmul.f32 %v1515_v42, %v597_v3  ;;  %v609_v10 = vmul.f32 %v1515_v42, %v595_v2 }
 0x155   : > { %v579_v5 = vmul.f32 %v575_v63, %v573_v61  ;;  %v580_v8 = vmul.f32 %v576_v0, %v574_v62  ;;  %v785_v61 = vperm.slane %v1548_v57, 7  ;;  %v832_v62 = vld [vmem:[%s1849_s7] sm:$0xff] }
 0x156   : > { %v614_v0 = vmul.f32 %v610_v14, %v608_v47  ;;  %v615_v17 = vmul.f32 %v611_v15, %v609_v10  ;;  %836 = vperm.xlu1 %1209, %v832_v62   ;;  %v1211_v10 = vld [vmem:[%s1863_s1 + $0x10] ss:$0 sm:$0xff] }
 0x157   : > { %v583_v63 = vadd.f32 %v579_v5, %v1498_v39  ;;  %v584_v16 = vadd.f32 %v580_v8, %v1500_v40 }
 0x159   : > { %v623_v1 = vpop.permute.xlu1 %622  ;;  %v618_v15 = vadd.f32 %v614_v0, %v583_v63  ;;  %v619_v49 = vadd.f32 %v615_v17, %v584_v16  ;;  %v769_v16 = vsel %vm768_vm8, %v1639_v36, %v1621_v19  ;;  %v771_v0 = vsel %vm768_vm8, %v1621_v19, %v1639_v36 }
 0x15a   : > { %v662_v54 = vpop.permute.xlu0 %661  ;;  %v630_v9 = vsel %vm628_vm4, %v623_v1, %v627_v31  ;;  %v632_v27 = vsel %vm628_vm4, %v627_v31, %v623_v1 }
 0x15b   : > { %v643_v56 = vmul.f32 %v1522_v44, %v632_v27  ;;  %v644_v13 = vmul.f32 %v1522_v44, %v630_v9  ;;  %v665_v18 = vsel %vm663_vm5, %v658_v38, %v662_v54  ;;  %v667_v42 = vsel %vm663_vm5, %v662_v54, %v658_v38  ;;  %v798_v27 = vpop.permute.xlu2 %797 }
 0x15c   : > { %v678_v25 = vmul.f32 %v1527_v46, %v667_v42  ;;  %v679_v29 = vmul.f32 %v1527_v46, %v665_v18 }
 0x15d   : > { %v649_v40 = vmul.f32 %v645_v26, %v643_v56  ;;  %v650_v44 = vmul.f32 %v646_v28, %v644_v13 }
 0x15e   : > { %v684_v43 = vmul.f32 %v680_v50, %v678_v25  ;;  %v685_v54 = vmul.f32 %v681_v53, %v679_v29  ;;  %v786_v53 = vperm.slane %v1553_v58, 7 }
 0x15f   : > { %v653_v31 = vadd.f32 %v649_v40, %v618_v15  ;;  %v654_v37 = vadd.f32 %v650_v44, %v619_v49 }
 0x161   : > { %v689_v52 = vadd.f32 %v685_v54, %v654_v37  ;;  %v775_v5 = vpop.permute.xlu1 %774 }
 0x162   : > { %v697_v4 = vpop.permute.xlu0 %696  ;;  %v781_v17 = vmul.f32 %v775_v5, %v769_v16  ;;  %v782_v18 = vmul.f32 %v775_v5, %v771_v0  ;;  %v905_v0 = vld [vmem:[%s1851_s9] sm:$0x1] }
 0x163   : > { %v700_v22 = vsel %vm698_vm6, %v693_v45, %v697_v4  ;;  %v702_v39 = vsel %vm698_vm6, %v697_v4, %v693_v45  ;;  %v810_v49 = vpop.permute.xlu2 %809 }
 0x164   : > { %v713_v30 = vmul.f32 %v1531_v48, %v700_v22  ;;  %v714_v26 = vmul.f32 %v1531_v48, %v702_v39  ;;  %v688_v48 = vadd.f32 %v684_v43, %v653_v31  ;;  %v787_v44 = vmul.f32 %v785_v61, %v781_v17 }
 0x166   : > { %v719_v46 = vmul.f32 %v715_v6, %v713_v30  ;;  %v720_v45 = vmul.f32 %v716_v7, %v714_v26  ;;  %v791_v30 = vadd.f32 %v787_v44, %v1637_v35 }
 0x168   : > { %v723_v1 = vadd.f32 %v719_v46, %v688_v48 }
 0x169   : > { %v800_v15 = vpop.permute.xlu1 %799 }
 0x16a   : > { %v732_v14 = vpop.permute.xlu0 %731 }
 0x16b   : > { %v735_v23 = vsel %vm733_vm7, %v728_v11, %v732_v14  ;;  %v737_v24 = vsel %vm733_vm7, %v732_v14, %v728_v11  ;;  %v788_v14 = vmul.f32 %v786_v53, %v782_v18 }
 0x16c   : > { %v748_v28 = vmul.f32 %v1535_v51, %v735_v23  ;;  %v749_v38 = vmul.f32 %v1535_v51, %v737_v24 }
 0x16d   : > { %v792_v25 = vadd.f32 %v788_v14, %v1635_v34 }
 0x16e   : > { %v754_v51 = vmul.f32 %v750_v20, %v748_v28  ;;  %v755_v60 = vmul.f32 %v751_v21, %v749_v38  ;;  %v724_v20 = vadd.f32 %v720_v45, %v689_v52  ;;  %v830_v28 = vld [vmem:[%s1848_s6] sm:$0xff] }
 0x170   : > { %v758_v58 = vadd.f32 %v754_v51, %v723_v1  ;;  %v759_v4 = vadd.f32 %v755_v60, %v724_v20 }
 0x172   : > { %v767_v50 = vpop.permute.xlu0 %766 }
 0x173   : > { %v770_v6 = vsel %vm768_vm8, %v763_v41, %v767_v50  ;;  %v772_v7 = vsel %vm768_vm8, %v767_v50, %v763_v41 }
 0x174   : > { %v783_v2 = vmul.f32 %v1555_v59, %v770_v6  ;;  %v784_v21 = vmul.f32 %v1555_v59, %v772_v7  ;;  %v1212_v59 = vld [vmem:[%s1863_s1 + $0x18] ss:$0 sm:$0xff]  ;;  %v418_v6 = vld [vmem:[%s1862_s2 + $0x10] sm:$0xff] }
 0x175   : > { %1117 = vmatmul.msk.f32.gmra.mxu0 %vm441_vm1, %v418_v6  ;;  %1121 = vmatmul.msk.f32.gmra.mxu1 %vm441_vm1, %v418_v6 }
 0x176   : > { %v789_v57 = vmul.f32 %v785_v61, %v783_v2  ;;  %v790_v3 = vmul.f32 %v786_v53, %v784_v21  ;;  %v1304_v53 = vmov 256.0  }
 0x177   : > { %1213 = vrcp.f32 %v1304_v53 }
 0x178   : > { %v793_v8 = vadd.f32 %v789_v57, %v758_v58  ;;  %v794_v9 = vadd.f32 %v790_v3, %v759_v4  ;;  %v903_v58 = vld [vmem:[%s1850_s8] sm:$0xff]  ;;  %v904_v4 = vld [vmem:[%s1850_s8 + $0x8] sm:$0xf] }
 0x17a   : > { %v802_v47 = vpop.permute.xlu0 %801 }
 0x17b   : > { %v805_v11 = vsel %vm803_vm9, %v798_v27, %v802_v47  ;;  %v807_v56 = vsel %vm803_vm9, %v802_v47, %v798_v27 }
 0x17c   : > { %v818_v13 = vmul.f32 %v1614_v12, %v805_v11  ;;  %v819_v63 = vmul.f32 %v1614_v12, %v807_v56 }
 0x17d   : > { %v1214_v7 = vpop.eup %1213 }
 0x17e   : > { %v824_v42 = vmul.f32 %v1211_v10, %v818_v13  ;;  %v825_v22 = vmul.f32 %v1212_v59, %v819_v63  ;;  %v919_v62 = vmul.f32 256.0, %v1214_v7  ;;  %vm923_vm11 = vweird.f32 %v1214_v7 }
 0x180   : > { %v828_v39 = vadd.f32 %v824_v42, %v793_v8  ;;  %v829_v40 = vadd.f32 %v825_v22, %v794_v9  ;;  %v920_v1 = vsub.f32 1.0, %v919_v62  ;;  %v907_v22 = vld [vmem:[%s1852_s10 + $0x8] sm:$0xf] }
 0x182   : > { %1122 = vmatpush.msk.msra.mxu2 %vm451_vm0, %v828_v39  ;;  %1125 = vmatpush.msk.msra.mxu3 %vm451_vm0, %v829_v40  ;;  %v796_v12 = vpop.permute.xlu0 %795  ;;  %v921_v20 = vmul.f32 %v1214_v7, %v920_v1  ;;  %v906_v39 = vld [vmem:[%s1852_s10] sm:$0xff] }
 0x183   : > { %v804_v23 = vsel %vm803_vm9, %v796_v12, %v800_v15  ;;  %v806_v19 = vsel %vm803_vm9, %v800_v15, %v796_v12 }
 0x184   : > { %v816_v36 = vmul.f32 %v810_v49, %v804_v23  ;;  %v817_v24 = vmul.f32 %v810_v49, %v806_v19  ;;  %v922_v2 = vadd.f32 %v1214_v7, %v921_v20  ;;  %v421_v49 = vld [vmem:[%s1845_s3 + $0x10] sm:$0xff]  ;;  %v909_v23 = vld [vmem:[%s1853_s11 + $0x8] sm:$0xf]  ;;  %v908_v19 = vld [vmem:[%s1853_s11] sm:$0xff] }
 0x186   : > { %v823_v29 = vmul.f32 %v1212_v59, %v817_v24  ;;  %v822_v26 = vmul.f32 %v1211_v10, %v816_v36  ;;  %v924_v21 = vsel %vm923_vm11, %v1214_v7, %v922_v2 }
 0x188   : > { %v827_v31 = vadd.f32 %v823_v29, %v792_v25  ;;  %v826_v37 = vadd.f32 %v822_v26, %v791_v30 }
 0x18a   : > { %895 = vmatpush.msra.mxu3 %v827_v31  ;;  %872 = vmatpush.msra.mxu2 %v826_v37  ;;  %v842_v46 = vpop.permute.xlu0 %841 }
 0x18b   : > { %1123 = vmatmul.msk.f32.vlgmr.msra.gmra.mxu2 %vm844_vm10, %v830_v28  ;;  %1126 = vmatmul.msk.f32.vlgmr.msra.gmra.mxu3 %vm844_vm10, %v830_v28 }
 0x193   : > { %1124 = vmatmul.msk.f32.gmra.mxu2 %vm844_vm10, %v831_v55  ;;  %1127 = vmatmul.msk.f32.gmra.mxu3 %vm844_vm10, %v831_v55 }
 0x1c8   : > { %v837_v34 = vpop.permute.xlu1 %836 }
 0x20e   : > { %v874_v35 = vpop.f32.mrf.mxu2  ;;  %v897_v38 = vpop.f32.mrf.mxu3 }
 0x20f   : > { %v1750_v41 = vadd.f32 %v874_v35, %v837_v34  ;;  %v1752_v43 = vadd.f32 %v897_v38, %v837_v34 }
 0x211   : > { %v910_v54 = vadd.f32 %v1752_v43, %v1750_v41 }
 0x213   : > { %911 = vadd.xlane.f32.xlu2 %v910_v54 }
 0x216   : > { %v877_v45 = vpop.f32.mrf.mxu2  ;;  %v900_v48 = vpop.f32.mrf.mxu3 }
 0x217   : > { %v1756_v52 = vadd.f32 %v877_v45, %v842_v46  ;;  %v1758_v51 = vadd.f32 %v900_v48, %v842_v46 }
 0x219   : > { %v913_v60 = vsel %vm451_vm0, %v1756_v52, 0.0  ;;  %v914_v50 = vsel %vm451_vm0, %v1758_v51, 0.0 }
 0x21a   : > { %v915_v61 = vadd.f32 %v914_v50, %v913_v60 }
 0x21c   : > { %916 = vadd.xlane.f32.xlu0 %v915_v61 }
 0x286   : > { %v912_v57 = vpop.xlane.xlu2 %911 }
 0x287   : > { %v925_v3 = vmul.f32 %v924_v21, %v912_v57 }
 0x289   : > { %v927_v8 = vmul.f32 %v925_v3, %v903_v58 }
 0x28b   : > { %v930_v47 = vsel %vm929_vm12, %v927_v8, 0.0  ;;  %v505_v8 = vpop.f32.mrf.mxu1 }
 0x28f   : > { %v917_v5 = vpop.xlane.xlu0 %916 }
 0x290   : > { %v926_v9 = vmul.f32 %v924_v21, %v917_v5  ;;  %v479_v5 = vpop.f32.mrf.mxu0 }
 0x292   : > { %v928_v27 = vmul.f32 %v926_v9, %v904_v4 }
 0x294   : > { %v932_v10 = vsel %vm931_vm13, %v928_v27, 0.0 }
 0x295   : > { %v933_v59 = vadd.f32 %v932_v10, %v930_v47 }
 0x297   : > { %v934_v11 = vrot.slane %v933_v59, 4 }
 0x299   : > { %v935_v56 = vadd.f32 %v934_v11, %v933_v59 }
 0x29b   : > { %v936_v13 = vrot.slane %v935_v56, 2 }
 0x29d   : > { %v937_v63 = vadd.f32 %v936_v13, %v935_v56  ;;  %v1007_v56 = vrot.slane %v1487_v32, 4  ;;  %v1010_v13 = vrot.slane %v1489_v33, 4 }
 0x29f   : > { %v938_v16 = vrot.slane %v937_v63, 1 }
 0x2a1   : > { %v939_v17 = vadd.f32 %v938_v16, %v937_v63 }
 0x2a3   : > { %v940_v18 = vadd.f32 %v939_v17, %v905_v0 }
 0x2a5   : > { %v941_v42 = vmax.f32 %v940_v18, 0.0 }
 0x2a7   : > { %v942_v40 = vperm.slane %v941_v42, 0 }
 0x2a9   : > { %v944_v44 = vmul.f32 %v942_v40, %v907_v22  ;;  %v943_v14 = vmul.f32 %v942_v40, %v906_v39 }
 0x2ab   : > { %v948_v15 = vsel %vm931_vm13, %v944_v44, 0.0  ;;  %v945_v12 = vsel %vm929_vm12, %v943_v14, 0.0 }
 0x2ac   : > { %949 = vadd.xlane.f32.xlu2 %v948_v15  ;;  %946 = vadd.xlane.f32.xlu1 %v945_v12 }
 0x2c4   : > { %434 = vperm.xlu2 %1210, %v421_v49  }
 0x31f   : > { %v950_v36 = vpop.xlane.xlu2 %949  ;;  %v947_v24 = vpop.xlane.xlu1 %946 }
 0x320   : > { %v952_v25 = vadd.f32 %v950_v36, %v909_v23  ;;  %v951_v29 = vadd.f32 %v947_v24, %v908_v19 }
 0x322   : > { %v954_v30 = vsub.f32 0.0, %v952_v25  ;;  %v953_v26 = vsub.f32 0.0, %v951_v29 }
 0x324   : > { %v957_v31 = vmul.f32 1.442695, %v954_v30  ;;  %v955_v37 = vmul.f32 1.442695, %v953_v26 }
 0x326   : > { %1215 = vpow2.f32 %v957_v31 }
 0x327   : > { %1217 = vpow2.f32 %v955_v37  ;;  %v435_v9 = vpop.permute.xlu2 %434 }
 0x328   : > { %v480_v27 = vadd.f32 %v479_v5, %v435_v9  ;;  %v506_v47 = vadd.f32 %v505_v8, %v435_v9 }
 0x32a   : > { %v1008_v10 = vrot.slane %v480_v27, 4  ;;  %v1011_v59 = vrot.slane %v506_v47, 4 }
 0x32c   : > { %v1216_v28 = vpop.eup %1215  ;;  %v1009_v42 = vsel %vm451_vm0, %v1007_v56, %v1008_v10  ;;  %v1012_v22 = vsel %vm451_vm0, %v1010_v13, %v1011_v59 }
 0x32d   : > { %v1218_v55 = vpop.eup %1217  ;;  %v960_v34 = vadd.f32 1.0, %v1216_v28 }
 0x32e   : > { %v959_v35 = vadd.f32 1.0, %v1218_v55 }
 0x32f   : > { %1219 = vrcp.f32 %v960_v34  ;;  %v986_v60 = vand.u32 2147483648, %v960_v34  ;;  %v984_v53 = vand.u32 2147483647, %v960_v34  ;;  %vm980_vm1 = vweird.f32 %v960_v34 }
 0x330   : > { %1221 = vrcp.f32 %v959_v35  ;;  %v972_v6 = vand.u32 2147483648, %v959_v35  ;;  %v970_v62 = vand.u32 2147483647, %v959_v35  ;;  %vm966_vm3 = vweird.f32 %v959_v35 }
 0x331   : > { %v987_v20 = vor.u32 1.1754944e-38, %v986_v60  ;;  %vm985_vm4 = vcmp.eq.f32.partialorder %v984_v53, 8.507059e+37 }
 0x332   : > { %v973_v57 = vor.u32 1.1754944e-38, %v972_v6  ;;  %vm971_vm6 = vcmp.eq.f32.partialorder %v970_v62, 8.507059e+37 }
 0x335   : > { %v1220_v38 = vpop.eup %1219 }
 0x336   : > { %v1222_v54 = vpop.eup %1221  ;;  %v976_v46 = vmul.f32 %v1220_v38, %v960_v34  ;;  %vm981_vm14 = vweird.f32 %v1220_v38 }
 0x337   : > { %v962_v45 = vmul.f32 %v1222_v54, %v959_v35  ;;  %vm967_vm15 = vweird.f32 %v1222_v54  ;;  %vm982_vm2 = vmor %vm980_vm1, %vm981_vm14 }
 0x338   : > { %v977_v48 = vsub.f32 1.0, %v976_v46  ;;  %vm968_vm5 = vmor %vm966_vm3, %vm967_vm15 }
 0x339   : > { %v963_v50 = vsub.f32 1.0, %v962_v45 }
 0x33a   : > { %v978_v61 = vmul.f32 %v1220_v38, %v977_v48 }
 0x33b   : > { %v964_v7 = vmul.f32 %v1222_v54, %v963_v50 }
 0x33c   : > { %v979_v1 = vadd.f32 %v1220_v38, %v978_v61 }
 0x33d   : > { %v965_v2 = vadd.f32 %v1222_v54, %v964_v7 }
 0x33e   : > { %v983_v21 = vsel %vm982_vm2, %v1220_v38, %v979_v1 }
 0x33f   : > { %v988_v3 = vsel %vm985_vm4, %v987_v20, %v983_v21  ;;  %v969_v58 = vsel %vm968_vm5, %v1222_v54, %v965_v2 }
 0x340   : > { %996 = vperm.xlu1 %1209, %v988_v3   ;;  %v974_v4 = vsel %vm971_vm6, %v973_v57, %v969_v58 }
 0x341   : > { %991 = vperm.xlu0 %1193, %v974_v4  }
 0x3b2   : > { %v997_v11 = vpop.permute.xlu1 %996 }
 0x3b3   : > { %v992_v63 = vpop.permute.xlu0 %991  ;;  %v1001_v16 = vmul.f32 %v997_v11, %v1756_v52  ;;  %v1002_v0 = vmul.f32 %v997_v11, %v1758_v51 }
 0x3b4   : > { %v999_v17 = vmul.f32 %v992_v63, %v1750_v41  ;;  %v1000_v18 = vmul.f32 %v992_v63, %v1752_v43 }
 0x3b5   : > { %v1019_v32 = vadd.f32 %v1008_v10, %v1001_v16  ;;  %v1020_v39 = vadd.f32 %v1011_v59, %v1002_v0 }
 0x3b6   : > { %v1017_v33 = vadd.f32 %v1009_v42, %v999_v17  ;;  %v1018_v40 = vadd.f32 %v1012_v22, %v1000_v18 }
 0x3b7   : > { %v1023_v52 = vmax.f32 %v1019_v32, 0.0  ;;  %v1024_v51 = vmax.f32 %v1020_v39, 0.0 }
 0x3b8   : > { %v1021_v41 = vmax.f32 %v1017_v33, 0.0  ;;  %v1022_v43 = vmax.f32 %v1018_v40, 0.0 }
 0x3b9   : > { %1027 = vst [vmem:[%s407_s25 + $0x10] sm:$0xf] %v1023_v52 }
 0x3ba   : > { %1025 = vst [vmem:[%s407_s25] sm:$0xff] %v1021_v41 }
 0x3bb   : > { %1026 = vst [vmem:[%s407_s25 + $0x8] sm:$0xff] %v1022_v43 }
 0x3bc   : > { %1028 = vst [vmem:[%s407_s25 + $0x18] sm:$0xf] %v1024_v51 }
 0x3bd   : > { %1250 = shalt.err (!%p1247_p3)
}
 0x3be   : > { %s1305_s20 = smov 256   ;;  %s1306_s25 = smov 512  }
 0x3bf   : > { %s1864_s2 = smov 16  }
 0x3c0   : > { %1134 = dma.vmem_to_hbm [thread:$0]  (%p1410_p5), %s1043_s18, 512, %s1045_s19, %s1030_s28, %s1305_s20, %s1306_s25, %s1864_s2  }
 0x3c1 PF: > { %p1140_p4 = scmp.ge.s32.totalorder %s1285_s24, 2  ;;  %s1059_s26 = sand.u32 1, %s1273_s21  }
 0x3c2   : > { %s1060_s0 = scalar_lea.sflag [#allocation3], %s1059_s26 }
 0x3c3   : > { %p1137_p7 = pnand %p1140_p4, %p1414_p6 }
 0x3c5   : > { %p1138_p8 = pneg %p1137_p7 }
 0x3c7   : > { %1268 = dma.done.wait (%p1138_p8), %s1060_s0, 512  }
 0x3c8   : > { %1270 = vsyncadd (%p1138_p8), %s1060_s0, 4294966784  ;;  %p22_p9 = scmp.ge.s32.totalorder %s1397_s27, 4   ;;  %s1865_s21 = smov %s1277_s22 }
 0x3c9   : > { %s1866_s22 = smov %s1281_s23  ;;  %s1867_s23 = smov %s1408_s30 }
 0x3ca   : > { %s1868_s24 = smov %s1397_s27  ;;  %24 = sbr.rel (!%p22_p9) target bundleno = 7 (0x7), region = 103 }
 0x3cf   :  { %1066 = vsyncpa [#allocation3], 1 }
 0x3d0   :  { %1068 = vsyncpa [#allocation3 + $0x1], 1 }

</bundles_post_ra>
